<compile_context>
chip_gen: v7x
topology: tpu7x:2x2x1
jax: 0.10.0
libtpu: 0.0.40
codegen_flags: <defaults>
</compile_context>

<pallas_src>
import math

import jax
import jax.numpy as jnp
from jax.experimental import pallas as pl
from jax.experimental.pallas import tpu as pltpu


def _round_up(x, m):
    return ((x + m - 1) // m) * m


def _lcm(a, b):
    return a * b // math.gcd(a, b)


# ---------------- node-stage kernel ----------------
# For one tile of node rows, reduce A_hat @ X over the N (column) axis into a VMEM
# accumulator, then at the final reduction step compute
#   h    = relu(acc @ W + b_gcn)
#   proj = h @ Wcat            (Wcat[:,0] = w_pred[:D], Wcat[:,1] = w_pred[D:], rest zero)
def _node_kernel(a_ref, x_ref, w_ref, bg_ref, wcat_ref, proj_ref, acc_ref):
    k = pl.program_id(1)

    @pl.when(k == 0)
    def _():
        acc_ref[...] = jnp.zeros_like(acc_ref)

    acc_ref[...] += jnp.dot(a_ref[...], x_ref[...],
                            preferred_element_type=jnp.float32)

    @pl.when(k == pl.num_programs(1) - 1)
    def _():
        h = jnp.dot(acc_ref[...], w_ref[...], preferred_element_type=jnp.float32)
        h = jnp.maximum(h + bg_ref[...], 0.0)
        proj_ref[...] = jnp.dot(h, wcat_ref[...],
                                preferred_element_type=jnp.float32)


# ---------------- edge-stage epilogue kernel ----------------
# probs = sigmoid(s[src] + t[dst] + b_pred) on a sublane+lane-dense (te, 128) tile.
def _edge_kernel(bp_ref, s_ref, t_ref, out_ref):
    out_ref[...] = jax.nn.sigmoid(s_ref[...] + t_ref[...] + bp_ref[0])


def macro_gcn_forward(features, edges, w_gcn, b_gcn, w_pred, b_pred,
                      *, tm=256, tk=512, te=512):
    """features: (N, F) f32, edges: (2, E) int32. Returns (E,) f32 predictions."""
    N, F = features.shape
    E = edges.shape[1]
    D = w_gcn.shape[1]
    f32 = jnp.float32

    # ---- glue: PyG-style gcn_norm (add self-loops, D^-1/2 (A+I) D^-1/2) ----
    loops = jnp.stack([jnp.arange(N, dtype=edges.dtype)] * 2)
    ei = jnp.concatenate([edges, loops], axis=1)          # assumes no pre-existing self-loops
    row, col = ei[0], ei[1]
    deg = jnp.zeros((N,), f32).at[col].add(1.0)
    dinv = jnp.where(deg > 0, jax.lax.rsqrt(deg), 0.0)
    norm = dinv[row] * dinv[col]
    a_hat = jnp.zeros((N, N), f32).at[col, row].add(norm)
    # TODO(synk): for large sparse graphs, keep A_hat in CSR form and DMA-gather neighbor rows
    #             instead of densifying to (N, N).

    # ---- padding to TPU-friendly (8,128)-aligned shapes ----
    F_pad = _round_up(F, 128)
    D_pad = _round_up(D, 128)
    N_pad = _round_up(N, 128)
    tm = min(tm, N_pad)
    tk = min(tk, N_pad)
    N_pad = _round_up(N_pad, _lcm(tm, tk))

    a_pad = jnp.zeros((N_pad, N_pad), f32).at[:N, :N].set(a_hat)
    x_pad = jnp.zeros((N_pad, F_pad), f32).at[:N, :F].set(features)
    w_pad = jnp.zeros((F_pad, D_pad), f32).at[:F, :D].set(w_gcn)
    bg_pad = jnp.zeros((1, D_pad), f32).at[:, :D].set(b_gcn)
    # combined projection weights, lane-padded to one full 128-wide MXU output tile
    wcat = jnp.zeros((D_pad, 128), f32)
    wcat = wcat.at[:D, 0].set(w_pred[:D, 0]).at[:D, 1].set(w_pred[D:, 0])

    grid = (N_pad // tm, N_pad // tk)
    proj = pl.pallas_call(
        _node_kernel,
        out_shape=jax.ShapeDtypeStruct((N_pad, 128), f32),
        grid_spec=pltpu.PrefetchScalarGridSpec(
            num_scalar_prefetch=0,
            grid=grid,
            in_specs=[
                pl.BlockSpec((tm, tk), lambda i, k: (i, k)),        # A_hat row/col tile
                pl.BlockSpec((tk, F_pad), lambda i, k: (k, 0)),     # X column-matched tile
                pl.BlockSpec((F_pad, D_pad), lambda i, k: (0, 0)),  # W_gcn (whole)
                pl.BlockSpec((1, D_pad), lambda i, k: (0, 0)),      # b_gcn
                pl.BlockSpec((D_pad, 128), lambda i, k: (0, 0)),    # Wcat
            ],
            out_specs=pl.BlockSpec((tm, 128), lambda i, k: (i, 0)),
            scratch_shapes=[pltpu.VMEM((tm, F_pad), f32)],
        ),
        compiler_params=pltpu.CompilerParams(
            dimension_semantics=("parallel", "arbitrary"),
            vmem_limit_bytes=64 << 20),
    )(a_pad, x_pad, w_pad, bg_pad, wcat)

    # Per-edge gather of the tiny per-node projections; data-dependent on a kernel
    # intermediate, so done in plain JAX (O(E) scalars).
    # TODO(synk): for very large E, replace with a scalar-prefetch DMA-gather Pallas stage.
    src, dst = edges[0], edges[1]
    s_src = proj[src, 0]
    t_dst = proj[dst, 1]

    # Pack edge scalars into a sublane+lane-dense (R_pad, 128) slab for the epilogue.
    R = max(1, -(-E // 128))
    R_pad = _round_up(R, 8)
    te = min(te, R_pad)
    R_pad = _round_up(R_pad, te)
    E_slab = R_pad * 128
    s_p = jnp.zeros((E_slab,), f32).at[:E].set(s_src).reshape(R_pad, 128)
    t_p = jnp.zeros((E_slab,), f32).at[:E].set(t_dst).reshape(R_pad, 128)
    bp = b_pred.reshape(-1)[:1].astype(f32)

    probs = pl.pallas_call(
        _edge_kernel,
        out_shape=jax.ShapeDtypeStruct((R_pad, 128), f32),
        grid_spec=pltpu.PrefetchScalarGridSpec(
            num_scalar_prefetch=0,
            grid=(R_pad // te,),
            in_specs=[
                pl.BlockSpec(memory_space=pltpu.MemorySpace.SMEM),   # scalar bias
                pl.BlockSpec((te, 128), lambda i: (i, 0)),
                pl.BlockSpec((te, 128), lambda i: (i, 0)),
            ],
            out_specs=pl.BlockSpec((te, 128), lambda i: (i, 0)),
        ),
        compiler_params=pltpu.CompilerParams(
            dimension_semantics=("parallel",)),
    )(bp, s_p, t_p)

    return probs.reshape(-1)[:E]


def macro_gcn_reference(features, edges, w_gcn, b_gcn, w_pred, b_pred):
    N = features.shape[0]
    loops = jnp.stack([jnp.arange(N, dtype=edges.dtype)] * 2)
    ei = jnp.concatenate([edges, loops], axis=1)
    row, col = ei[0], ei[1]
    deg = jnp.zeros((N,), jnp.float32).at[col].add(1.0)
    dinv = jnp.where(deg > 0, jax.lax.rsqrt(deg), 0.0)
    norm = dinv[row] * dinv[col]
    a_hat = jnp.zeros((N, N), jnp.float32).at[col, row].add(norm)
    h = jax.nn.relu(a_hat @ (features @ w_gcn) + b_gcn)
    src, dst = edges[0], edges[1]
    ef = jnp.concatenate([h[src], h[dst]], axis=1)
    return jax.nn.sigmoid((ef @ w_pred + b_pred)[:, 0])


if __name__ == "__main__":
    # small shapes: N nodes, F input features, D = args.macro_gcn_dimensions, E macro edges
    N, F, D, E = 16, 8, 32, 24
    key = jax.random.PRNGKey(0)
    k_x, k_e1, k_e2, k_w, k_p = jax.random.split(key, 5)

    features = jax.random.normal(k_x, (N, F), dtype=jnp.float32)
    src = jax.random.randint(k_e1, (E,), 0, N, dtype=jnp.int32)
    off = jax.random.randint(k_e2, (E,), 1, N, dtype=jnp.int32)
    dst = (src + off) % N                                  # no self-loops in the example graph
    edges = jnp.stack([src, dst])                          # (2, E)

    # deterministic synthetic parameters (shapes from GCNConv(F, D) and Linear(2D, 1))
    w_gcn = jax.random.normal(k_w, (F, D), dtype=jnp.float32) / jnp.sqrt(F)
    b_gcn = jnp.zeros((1, D), dtype=jnp.float32)
    w_pred = jax.random.normal(k_p, (2 * D, 1), dtype=jnp.float32) / jnp.sqrt(2 * D)
    b_pred = jnp.zeros((1, 1), dtype=jnp.float32)

    fwd = jax.jit(macro_gcn_forward)
    out = fwd(features, edges, w_gcn, b_gcn, w_pred, b_pred)
    out = jax.block_until_ready(out)

    ref = macro_gcn_reference(features, edges, w_gcn, b_gcn, w_pred, b_pred)
    assert out.shape == (E,)
    assert jnp.allclose(out, ref, atol=1e-5, rtol=1e-5)
    print("KERNEL_OK")
</pallas_src>

<mosaic_0001>
module attributes {stable_mosaic.version = 11 : i64} {
  func.func @_node_kernel(%arg0: i32, %arg1: i32, %arg2: memref<128x128xf32, #tpu.memory_space<vmem>>, %arg3: memref<128x128xf32, #tpu.memory_space<vmem>>, %arg4: memref<128x128xf32, #tpu.memory_space<vmem>>, %arg5: memref<1x128xf32, #tpu.memory_space<vmem>>, %arg6: memref<128x128xf32, #tpu.memory_space<vmem>>, %arg7: memref<128x128xf32, #tpu.memory_space<vmem>>, %arg8: memref<128x128xf32, #tpu.memory_space<vmem>>) attributes {dimension_semantics = [#tpu.dimension_semantics<parallel>, #tpu.dimension_semantics<arbitrary>], iteration_bounds = array<i64: 1, 1>, scalar_prefetch = 0 : i64, scratch_operands = 1 : i64, tpu.core_type = #tpu.core_type<tc>, window_params = [{transform_indices = @transform_0, window_bounds = array<i64: 128, 128>}, {transform_indices = @transform_1, window_bounds = array<i64: 128, 128>}, {pipeline_mode = #tpu.pipeline_mode<synchronous>, transform_indices = @transform_2, window_bounds = array<i64: 128, 128>}, {pipeline_mode = #tpu.pipeline_mode<synchronous>, transform_indices = @transform_3, window_bounds = array<i64: 1, 128>}, {pipeline_mode = #tpu.pipeline_mode<synchronous>, transform_indices = @transform_4, window_bounds = array<i64: 128, 128>}, {transform_indices = @transform_5, window_bounds = array<i64: 128, 128>}]} {
    %c0_i32 = arith.constant 0 : i32
    %0 = arith.cmpi eq, %arg1, %c0_i32 : i32
    %1 = arith.extui %0 : i1 to i32
    %c0_i32_0 = arith.constant 0 : i32
    %2 = arith.cmpi ne, %1, %c0_i32_0 : i32
    scf.if %2 {
      %cst_10 = arith.constant 0.000000e+00 : f32
      %12 = vector.broadcast %cst_10 : f32 to vector<128x128xf32>
      %c0_11 = arith.constant 0 : index
      %c0_12 = arith.constant 0 : index
      %13 = vector.load %arg8[%c0_11, %c0_12] : memref<128x128xf32, #tpu.memory_space<vmem>>, vector<128x128xf32>
      tpu.vector_store %arg8[%c0_11, %c0_12], %12 {strides = array<i32>} : memref<128x128xf32, #tpu.memory_space<vmem>>, vector<128x128xf32>,
    } else {
    }
    %c0 = arith.constant 0 : index
    %c0_1 = arith.constant 0 : index
    %3 = vector.load %arg8[%c0, %c0_1] : memref<128x128xf32, #tpu.memory_space<vmem>>, vector<128x128xf32>
    %c0_2 = arith.constant 0 : index
    %c0_3 = arith.constant 0 : index
    %4 = vector.load %arg2[%c0_2, %c0_3] : memref<128x128xf32, #tpu.memory_space<vmem>>, vector<128x128xf32>
    %c0_4 = arith.constant 0 : index
    %c0_5 = arith.constant 0 : index
    %5 = vector.load %arg3[%c0_4, %c0_5] : memref<128x128xf32, #tpu.memory_space<vmem>>, vector<128x128xf32>
    %cst = arith.constant dense<0.000000e+00> : vector<128x128xf32>
    %6 = tpu.matmul %4, %5, %cst {dimension_numbers = #tpu.dot_dimension_numbers<[1], [0], [0], [1], [0, 0, 1, 1], [], []>} : vector<128x128xf32>, vector<128x128xf32>, vector<128x128xf32> -> vector<128x128xf32>
    %7 = arith.addf %3, %6 : vector<128x128xf32>
    %c0_6 = arith.constant 0 : index
    %c0_7 = arith.constant 0 : index
    %8 = vector.load %arg8[%c0_6, %c0_7] : memref<128x128xf32, #tpu.memory_space<vmem>>, vector<128x128xf32>
    tpu.vector_store %arg8[%c0_6, %c0_7], %7 {strides = array<i32>} : memref<128x128xf32, #tpu.memory_space<vmem>>, vector<128x128xf32>,
    %c0_i32_8 = arith.constant 0 : i32
    %9 = arith.cmpi eq, %arg1, %c0_i32_8 : i32
    %10 = arith.extui %9 : i1 to i32
    %c0_i32_9 = arith.constant 0 : i32
    %11 = arith.cmpi ne, %10, %c0_i32_9 : i32
    scf.if %11 {
      %c0_10 = arith.constant 0 : index
      %c0_11 = arith.constant 0 : index
      %12 = vector.load %arg8[%c0_10, %c0_11] : memref<128x128xf32, #tpu.memory_space<vmem>>, vector<128x128xf32>
      %c0_12 = arith.constant 0 : index
      %c0_13 = arith.constant 0 : index
      %13 = vector.load %arg4[%c0_12, %c0_13] : memref<128x128xf32, #tpu.memory_space<vmem>>, vector<128x128xf32>
      %cst_14 = arith.constant dense<0.000000e+00> : vector<128x128xf32>
      %14 = tpu.matmul %12, %13, %cst_14 {dimension_numbers = #tpu.dot_dimension_numbers<[1], [0], [0], [1], [0, 0, 1, 1], [], []>} : vector<128x128xf32>, vector<128x128xf32>, vector<128x128xf32> -> vector<128x128xf32>
      %c0_15 = arith.constant 0 : index
      %c0_16 = arith.constant 0 : index
      %15 = vector.load %arg5[%c0_15, %c0_16] : memref<1x128xf32, #tpu.memory_space<vmem>>, vector<1x128xf32>
      %16 = vector.broadcast %15 : vector<1x128xf32> to vector<128x128xf32>
      %17 = arith.addf %14, %16 : vector<128x128xf32>
      %cst_17 = arith.constant 0.000000e+00 : f32
      %18 = vector.broadcast %cst_17 : f32 to vector<128x128xf32>
      %19 = arith.maximumf %17, %18 : vector<128x128xf32>
      %c0_18 = arith.constant 0 : index
      %c0_19 = arith.constant 0 : index
      %20 = vector.load %arg6[%c0_18, %c0_19] : memref<128x128xf32, #tpu.memory_space<vmem>>, vector<128x128xf32>
      %cst_20 = arith.constant dense<0.000000e+00> : vector<128x128xf32>
      %21 = tpu.matmul %19, %20, %cst_20 {dimension_numbers = #tpu.dot_dimension_numbers<[1], [0], [0], [1], [0, 0, 1, 1], [], []>} : vector<128x128xf32>, vector<128x128xf32>, vector<128x128xf32> -> vector<128x128xf32>
      %c0_21 = arith.constant 0 : index
      %c0_22 = arith.constant 0 : index
      %22 = vector.load %arg7[%c0_21, %c0_22] : memref<128x128xf32, #tpu.memory_space<vmem>>, vector<128x128xf32>
      tpu.vector_store %arg7[%c0_21, %c0_22], %21 {strides = array<i32>} : memref<128x128xf32, #tpu.memory_space<vmem>>, vector<128x128xf32>,
    } else {
    }
    return
  }
  func.func @transform_0(%arg0: i32, %arg1: i32) -> (i32, i32) {
    %c0_i32 = arith.constant 0 : i32
    return %arg0, %arg1 : i32, i32
  }
  func.func @transform_1(%arg0: i32, %arg1: i32) -> (i32, i32) {
    %c0_i32 = arith.constant 0 : i32
    %c0_i32_0 = arith.constant 0 : i32
    return %arg1, %c0_i32 : i32, i32
  }
  func.func @transform_2(%arg0: i32, %arg1: i32) -> (i32, i32) {
    %c0_i32 = arith.constant 0 : i32
    %c0_i32_0 = arith.constant 0 : i32
    %c0_i32_1 = arith.constant 0 : i32
    return %c0_i32, %c0_i32_0 : i32, i32
  }
  func.func @transform_3(%arg0: i32, %arg1: i32) -> (i32, i32) {
    %c0_i32 = arith.constant 0 : i32
    %c0_i32_0 = arith.constant 0 : i32
    %c0_i32_1 = arith.constant 0 : i32
    return %c0_i32, %c0_i32_0 : i32, i32
  }
  func.func @transform_4(%arg0: i32, %arg1: i32) -> (i32, i32) {
    %c0_i32 = arith.constant 0 : i32
    %c0_i32_0 = arith.constant 0 : i32
    %c0_i32_1 = arith.constant 0 : i32
    return %c0_i32, %c0_i32_0 : i32, i32
  }
  func.func @transform_5(%arg0: i32, %arg1: i32) -> (i32, i32) {
    %c0_i32 = arith.constant 0 : i32
    %c0_i32_0 = arith.constant 0 : i32
    return %arg0, %c0_i32 : i32, i32
  }
}

module attributes {stable_mosaic.version = 11 : i64} {
  func.func @_edge_kernel(%arg0: i32, %arg1: memref<1xf32, #tpu.memory_space<smem>>, %arg2: memref<8x128xf32, #tpu.memory_space<vmem>>, %arg3: memref<8x128xf32, #tpu.memory_space<vmem>>, %arg4: memref<8x128xf32, #tpu.memory_space<vmem>>) attributes {dimension_semantics = [#tpu.dimension_semantics<parallel>], iteration_bounds = array<i64: 1>, scalar_prefetch = 0 : i64, scratch_operands = 0 : i64, tpu.core_type = #tpu.core_type<tc>, window_params = [{transform_indices = @transform_0, window_bounds = array<i64: 1>}, {transform_indices = @transform_1, window_bounds = array<i64: 8, 128>}, {transform_indices = @transform_2, window_bounds = array<i64: 8, 128>}, {transform_indices = @transform_3, window_bounds = array<i64: 8, 128>}]} {
    %c0 = arith.constant 0 : index
    %c0_0 = arith.constant 0 : index
    %0 = vector.load %arg2[%c0, %c0_0] : memref<8x128xf32, #tpu.memory_space<vmem>>, vector<8x128xf32>
    %c0_1 = arith.constant 0 : index
    %c0_2 = arith.constant 0 : index
    %1 = vector.load %arg3[%c0_1, %c0_2] : memref<8x128xf32, #tpu.memory_space<vmem>>, vector<8x128xf32>
    %2 = arith.addf %0, %1 : vector<8x128xf32>
    %c0_3 = arith.constant 0 : index
    %3 = memref.load %arg1[%c0_3] : memref<1xf32, #tpu.memory_space<smem>>
    %4 = vector.broadcast %3 : f32 to vector<8x128xf32>
    %5 = arith.addf %2, %4 : vector<8x128xf32>
    %6 = arith.negf %5 : vector<8x128xf32>
    %7 = math.exp %6 : vector<8x128xf32>
    %cst = arith.constant 1.000000e+00 : f32
    %8 = vector.broadcast %cst : f32 to vector<8x128xf32>
    %9 = arith.addf %8, %7 : vector<8x128xf32>
    %10 = arith.divf %8, %9 : vector<8x128xf32>
    %c0_4 = arith.constant 0 : index
    %c0_5 = arith.constant 0 : index
    %11 = vector.load %arg4[%c0_4, %c0_5] : memref<8x128xf32, #tpu.memory_space<vmem>>, vector<8x128xf32>
    tpu.vector_store %arg4[%c0_4, %c0_5], %10 {strides = array<i32>} : memref<8x128xf32, #tpu.memory_space<vmem>>, vector<8x128xf32>,
    return
  }
  func.func @transform_0(%arg0: i32) -> i32 {
    %c0_i32 = arith.constant 0 : i32
    %c0_i32_0 = arith.constant 0 : i32
    return %c0_i32 : i32
  }
  func.func @transform_1(%arg0: i32) -> (i32, i32) {
    %c0_i32 = arith.constant 0 : i32
    %c0_i32_0 = arith.constant 0 : i32
    return %arg0, %c0_i32 : i32, i32
  }
  func.func @transform_2(%arg0: i32) -> (i32, i32) {
    %c0_i32 = arith.constant 0 : i32
    %c0_i32_0 = arith.constant 0 : i32
    return %arg0, %c0_i32 : i32, i32
  }
  func.func @transform_3(%arg0: i32) -> (i32, i32) {
    %c0_i32 = arith.constant 0 : i32
    %c0_i32_0 = arith.constant 0 : i32
    return %arg0, %c0_i32 : i32, i32
  }
}

</mosaic_0001>

<bundles_post_ra>
// kernel: mul.1
= control target key start
LH: loop header
LB: loop body
LE: loop exit
PB: predicated region body
PF: predicated region fallthrough
CT: control target
= control target key end

     0   :  { %s34_s0 = inlined_call_operand.vmem [shape: f32[40], index: 0, kind: input, shape index: {}]   ;;  %s35_s1 = inlined_call_operand.vmem [shape: f32[40], index: 1, kind: input, shape index: {}]   ;;  %s36_s2 = inlined_call_operand.vmem [shape: f32[40], index: 2, kind: output, shape index: {}]  }
   0x1   :  { %v3_v0 = vld [vmem:[%s34_s0] sm:$0x1] }
   0x2   :  { %v4_v1 = vld [vmem:[%s35_s1] sm:$0x1] }
   0x3   :  { %v7_v2 = vmul.f32 %v4_v1, %v3_v0 }
   0x5   :  { %9 = vst [vmem:[%s36_s2] sm:$0x1] %v7_v2 }

// kernel: macro_gcn_forward.2
= control target key start
LH: loop header
LB: loop body
LE: loop exit
PB: predicated region body
PF: predicated region fallthrough
CT: control target
= control target key end

     0   :  { %10 = vsyncpa [#allocation4], 0  ;;  %s1396_s0 = inlined_call_operand.hbm [shape: f32[128,128], index: 0, kind: input, shape index: {}]   ;;  %s1397_s1 = inlined_call_operand.hbm [shape: f32[128,128], index: 1, kind: input, shape index: {}]   ;;  %s1398_s2 = inlined_call_operand.hbm [shape: f32[128,128], index: 2, kind: input, shape index: {}]   ;;  %s1399_s3 = inlined_call_operand.hbm [shape: f32[1,128], index: 3, kind: input, shape index: {}]   ;;  %s1400_s4 = inlined_call_operand.hbm [shape: f32[128,128], index: 4, kind: input, shape index: {}]   ;;  %s1401_s5 = inlined_call_operand.hbm [shape: f32[128,128], index: 5, kind: output, shape index: {}]  }
   0x1   :  { %11 = vsyncpa [#allocation7], 0 }
   0x2   :  { %12 = vsyncpa [#allocation10], 0 }
   0x3   :  { %13 = vsyncpa [#allocation5], 0  ;;  %s1256_s18 = smov [#allocation6]   ;;  %s1257_s20 = smov [#allocation9]  }
   0x4   :  { %s31_s19 = sshll.u32 %s1256_s18, 4  ;;  %s56_s21 = sshll.u32 %s1257_s20, 4  ;;  %s32_s19 = int_to_ptr.vmem [resolvable:$true] %s31_s19  ;;  %s1294_s21 = int_to_ptr.vmem [resolvable:$true] %s56_s21 }
   0x5   :  { %s1116_s24 = scalar_lea.hbm %s1397_s1, 2048 }
   0x6   :  { %p1117_p0 = scmp.ne.s32.totalorder %s1397_s1, %s1116_s24  ;;  %p1120_p1 = scmp.lt.u32.totalorder %s1116_s24, %s1397_s1 }
   0x8   :  { %p1122_p2 = pnand %p1120_p1, %p1117_p0 }
   0xa   :  { %1125 = shalt.err (!%p1122_p2)
}
   0xb   :  { %s1126_s29 = scalar_lea.vmem %s32_s19, 2048  ;;  %p1131_p4 = scmp.lt.s32.totalorder %s32_s19, %s32_s19 }
   0xc   :  { %p1127_p3 = scmp.ne.s32.totalorder %s32_s19, %s1126_s29  ;;  %p1132_p5 = scmp.lt.s32.totalorder %s1126_s29, %s1126_s29 }
   0xe   :  { %p1133_p6 = por %p1132_p5, %p1131_p4 }
  0x10   :  { %p1134_p7 = pnand %p1133_p6, %p1127_p3 }
  0x12   :  { %1137 = shalt.err (!%p1134_p7)
}
  0x13   :  { %s1258_s30 = smov 128   ;;  %s1259_s6 = smov 8  }
  0x14   :  { %37 = dma.hbm_to_vmem [thread:$0]  %s1397_s1, 2048, %s32_s19, [#allocation7], %s1258_s30, %s1258_s30, %s1259_s6  }
  0x15   :  { %s1138_s11 = scalar_lea.hbm %s1399_s3, 16 }
  0x16   :  { %p1139_p8 = scmp.ne.s32.totalorder %s1399_s3, %s1138_s11  ;;  %p1142_p9 = scmp.lt.u32.totalorder %s1138_s11, %s1399_s3 }
  0x18   :  { %p1144_p10 = pnand %p1142_p9, %p1139_p8 }
  0x1a   :  { %1147 = shalt.err (!%p1144_p10)
}
  0x1b   :  { %s1148_s16 = scalar_lea.vmem %s1294_s21, 16  ;;  %s1152_s1 = scalar_lea.vmem %s1294_s21, 32 }
  0x1c   :  { %p1149_p11 = scmp.ne.s32.totalorder %s1294_s21, %s1148_s16  ;;  %p1153_p12 = scmp.lt.s32.totalorder %s1294_s21, %s1294_s21 }
  0x1d   :  { %p1154_p13 = scmp.lt.s32.totalorder %s1152_s1, %s1148_s16 }
  0x1f   :  { %p1155_p0 = por %p1154_p13, %p1153_p12 }
  0x21   :  { %p1156_p1 = pnand %p1155_p0, %p1149_p11 }
  0x23   :  { %1159 = shalt.err (!%p1156_p1)
}
  0x24   :  { %59 = dma.hbm_to_vmem [thread:$0]  %s1399_s3, 16, %s1294_s21, [#allocation10]  }
  0x25   :  { %s1260_s19 = smov [#allocation3]   ;;  %s1261_s22 = smov [#allocation8]  }
  0x26   :  { %s19_s20 = sshll.u32 %s1260_s19, 4  ;;  %s43_s23 = sshll.u32 %s1261_s22, 4  ;;  %s20_s20 = int_to_ptr.vmem [resolvable:$true] %s19_s20  ;;  %s1329_s23 = int_to_ptr.vmem [resolvable:$true] %s43_s23 }
  0x27   :  { %s1160_s26 = scalar_lea.hbm %s1396_s0, 2048 }
  0x28   :  { %p1161_p2 = scmp.ne.s32.totalorder %s1396_s0, %s1160_s26  ;;  %p1164_p3 = scmp.lt.u32.totalorder %s1160_s26, %s1396_s0 }
  0x2a   :  { %p1166_p4 = pnand %p1164_p3, %p1161_p2 }
  0x2c   :  { %1169 = shalt.err (!%p1166_p4)
}
  0x2d   :  { %s1170_s3 = scalar_lea.vmem %s20_s20, 2048  ;;  %p1175_p6 = scmp.lt.s32.totalorder %s20_s20, %s20_s20 }
  0x2e   :  { %p1171_p5 = scmp.ne.s32.totalorder %s20_s20, %s1170_s3  ;;  %p1176_p7 = scmp.lt.s32.totalorder %s1170_s3, %s1170_s3 }
  0x30   :  { %p1177_p8 = por %p1176_p7, %p1175_p6 }
  0x32   :  { %p1178_p9 = pnand %p1177_p8, %p1171_p5 }
  0x34   :  { %1181 = shalt.err (!%p1178_p9)
}
  0x35   :  { %25 = dma.hbm_to_vmem [thread:$0]  %s1396_s0, 2048, %s20_s20, [#allocation4], %s1258_s30, %s1258_s30, %s1259_s6  }
  0x36   :  { %s1182_s11 = scalar_lea.hbm %s1398_s2, 2048 }
  0x37   :  { %p1183_p10 = scmp.ne.s32.totalorder %s1398_s2, %s1182_s11  ;;  %p1186_p11 = scmp.lt.u32.totalorder %s1182_s11, %s1398_s2 }
  0x39   :  { %p1188_p12 = pnand %p1186_p11, %p1183_p10 }
  0x3b   :  { %1191 = shalt.err (!%p1188_p12)
}
  0x3c   :  { %s1192_s16 = scalar_lea.vmem %s1329_s23, 2048  ;;  %p1197_p0 = scmp.lt.s32.totalorder %s1329_s23, %s1329_s23 }
  0x3d   :  { %p1193_p13 = scmp.ne.s32.totalorder %s1329_s23, %s1192_s16  ;;  %p1198_p1 = scmp.lt.s32.totalorder %s1192_s16, %s1192_s16 }
  0x3f   :  { %p1199_p2 = por %p1198_p1, %p1197_p0 }
  0x41   :  { %p1200_p3 = pnand %p1199_p2, %p1193_p13 }
  0x43   :  { %1203 = shalt.err (!%p1200_p3)
}
  0x44   :  { %49 = dma.hbm_to_vmem [thread:$0]  %s1398_s2, 2048, %s1329_s23, [#allocation7], %s1258_s30, %s1258_s30, %s1259_s6  }
  0x45   :  { %s1262_s17 = smov [#allocation11]   ;;  %s1204_s22 = scalar_lea.hbm %s1400_s4, 2048 }
  0x46   :  { %s65_s18 = sshll.u32 %s1262_s17, 4  ;;  %p1205_p4 = scmp.ne.s32.totalorder %s1400_s4, %s1204_s22  ;;  %s66_s18 = int_to_ptr.vmem [resolvable:$true] %s65_s18 }
  0x47   :  { %p1208_p5 = scmp.lt.u32.totalorder %s1204_s22, %s1400_s4 }
  0x49   :  { %p1210_p6 = pnand %p1208_p5, %p1205_p4 }
  0x4b   :  { %1213 = shalt.err (!%p1210_p6)
}
  0x4c   :  { %s1214_s28 = scalar_lea.vmem %s66_s18, 2048  ;;  %p1219_p8 = scmp.lt.s32.totalorder %s66_s18, %s66_s18 }
  0x4d   :  { %p1215_p7 = scmp.ne.s32.totalorder %s66_s18, %s1214_s28  ;;  %p1220_p9 = scmp.lt.s32.totalorder %s1214_s28, %s1214_s28 }
  0x4f   :  { %p1221_p10 = por %p1220_p9, %p1219_p8 }
  0x51   :  { %p1222_p11 = pnand %p1221_p10, %p1215_p7 }
  0x53   :  { %1225 = shalt.err (!%p1222_p11)
}
  0x54   :  { %71 = dma.hbm_to_vmem [thread:$0]  %s1400_s4, 2048, %s66_s18, [#allocation10], %s1258_s30, %s1258_s30, %s1259_s6  }
  0x55   :  { %1248 = dma.done.wait [#allocation4], 2048  }
  0x56   :  { %1249 = vsyncadd [#allocation4], 4294965248 }
  0x57   :  { %1250 = dma.done.wait [#allocation7], 4096  }
  0x58   :  { %1251 = vsyncadd [#allocation7], 4294963200 }
  0x59   :  { %1252 = dma.done.wait [#allocation10], 2064  }
  0x5a   :  { %1253 = vsyncadd [#allocation10], 4294965232  ;;  %v139_v0 = vld [vmem:[#allocation6] sm:$0xff]  ;;  %v140_v1 = vld [vmem:[#allocation6 + $0x8] sm:$0xff]  ;;  %s1263_s4 = smov [#allocation12]  }
  0x5b   :  { %v141_v2 = vld [vmem:[#allocation6 + $0x10] sm:$0xff]  ;;  %v996_v3 = vpack.c.bf16 %v140_v1, %v139_v0  ;;  %v142_v4 = vld [vmem:[#allocation6 + $0x18] sm:$0xff]  ;;  %v143_v6 = vld [vmem:[#allocation6 + $0x20] sm:$0xff]  ;;  %s717_s29 = sshll.u32 %s1263_s4, 4  ;;  %s718_s29 = int_to_ptr.vmem [resolvable:$true] %s717_s29 }
  0x5c   :  { %v1000_v5 = vpack.c.bf16 %v142_v4, %v141_v2  ;;  %v144_v7 = vld [vmem:[#allocation6 + $0x28] sm:$0xff]  ;;  %v123_v9 = vld [vmem:[#allocation3] sm:$0xff]  ;;  %v145_v10 = vld [vmem:[#allocation6 + $0x30] sm:$0xff]  ;;  %s1226_s7 = scalar_lea.vmem %s718_s29, 2048  ;;  %p1231_p13 = scmp.lt.s32.totalorder %s718_s29, %s718_s29 }
  0x5d   :  { %997 = vmatprep.subr.bf16.mxu0 %v996_v3  ;;  %v1004_v8 = vpack.c.bf16 %v144_v7, %v143_v6  ;;  %v146_v11 = vld [vmem:[#allocation6 + $0x38] sm:$0xff]  ;;  %860 = vmatprep.mubr.f32.mxu0 %v123_v9  ;;  %v147_v13 = vld [vmem:[#allocation6 + $0x40] sm:$0xff]  ;;  %v148_v14 = vld [vmem:[#allocation6 + $0x48] sm:$0xff]  ;;  %p1227_p12 = scmp.ne.s32.totalorder %s718_s29, %s1226_s7  ;;  %p1232_p0 = scmp.lt.s32.totalorder %s1226_s7, %s1226_s7 }
  0x5e   :  { %999 = vmatpush3.bf16.msra.mxu0 %v996_v3  ;;  %v1008_v12 = vpack.c.bf16 %v146_v11, %v145_v10  ;;  %v351_v15 = vld [vmem:[#allocation8] sm:$0xff]  ;;  %v352_v16 = vld [vmem:[#allocation8 + $0x8] sm:$0xff]  ;;  %v353_v17 = vld [vmem:[#allocation8 + $0x10] sm:$0xff]  ;;  %v1012_v21 = vpack.c.bf16 %v148_v14, %v147_v13 }
  0x5f   :  { %1001 = vmatprep.subr.bf16.mxu0 %v1000_v5  ;;  %v354_v18 = vld [vmem:[#allocation8 + $0x18] sm:$0xff]  ;;  %v1028_v19 = vpack.c.bf16 %v352_v16, %v351_v15  ;;  %v355_v22 = vld [vmem:[#allocation8 + $0x20] sm:$0xff]  ;;  %v356_v23 = vld [vmem:[#allocation8 + $0x28] sm:$0xff]  ;;  %p1233_p1 = por %p1232_p0, %p1231_p13 }
  0x60   :  { %v1032_v20 = vpack.c.bf16 %v354_v18, %v353_v17  ;;  %v149_v24 = vld [vmem:[#allocation6 + $0x50] sm:$0xff]  ;;  %v150_v25 = vld [vmem:[#allocation6 + $0x58] sm:$0xff]  ;;  %v1036_v26 = vpack.c.bf16 %v356_v23, %v355_v22  ;;  %v151_v30 = vld [vmem:[#allocation6 + $0x60] sm:$0xff] }
  0x61   :  { %1029 = vmatprep.subr.bf16.mxu1 %v1028_v19  ;;  %v1016_v27 = vpack.c.bf16 %v150_v25, %v149_v24  ;;  %v357_v28 = vld [vmem:[#allocation8 + $0x30] sm:$0xff]  ;;  %v358_v29 = vld [vmem:[#allocation8 + $0x38] sm:$0xff]  ;;  %v152_v31 = vld [vmem:[#allocation6 + $0x68] sm:$0xff]  ;;  %p1234_p2 = pnand %p1233_p1, %p1227_p12 }
  0x62   :  { %1003 = vmatpush3.bf16.msra.mxu0 %v1000_v5  ;;  %1031 = vmatpush3.bf16.msra.mxu1 %v1028_v19  ;;  %v1040_v32 = vpack.c.bf16 %v358_v29, %v357_v28  ;;  %v1020_v33 = vpack.c.bf16 %v152_v31, %v151_v30  ;;  %v359_v34 = vld [vmem:[#allocation8 + $0x40] sm:$0xff]  ;;  %v360_v35 = vld [vmem:[#allocation8 + $0x48] sm:$0xff]  ;;  %v153_v36 = vld [vmem:[#allocation6 + $0x70] sm:$0xff] }
  0x63   :  { %1005 = vmatprep.subr.bf16.mxu0 %v1004_v8  ;;  %1033 = vmatprep.subr.bf16.mxu1 %v1032_v20  ;;  %v154_v37 = vld [vmem:[#allocation6 + $0x78] sm:$0xff]  ;;  %v1044_v38 = vpack.c.bf16 %v360_v35, %v359_v34  ;;  %v361_v40 = vld [vmem:[#allocation8 + $0x50] sm:$0xff]  ;;  %v363_v43 = vld [vmem:[#allocation8 + $0x60] sm:$0xff] }
  0x64   :  { %v1024_v39 = vpack.c.bf16 %v154_v37, %v153_v36  ;;  %v362_v41 = vld [vmem:[#allocation8 + $0x58] sm:$0xff]  ;;  %v364_v44 = vld [vmem:[#allocation8 + $0x68] sm:$0xff]  ;;  %v125_v47 = vld [vmem:[#allocation3 + $0x10] sm:$0xff] }
  0x65   :  { %v1048_v42 = vpack.c.bf16 %v362_v41, %v361_v40  ;;  %v124_v45 = vld [vmem:[#allocation3 + $0x8] sm:$0xff]  ;;  %v1052_v46 = vpack.c.bf16 %v364_v44, %v363_v43  ;;  %v365_v48 = vld [vmem:[#allocation8 + $0x70] sm:$0xff]  ;;  %v366_v49 = vld [vmem:[#allocation8 + $0x78] sm:$0xff] }
  0x66   :  { %1007 = vmatpush3.bf16.msra.mxu0 %v1004_v8  ;;  %1035 = vmatpush3.bf16.msra.mxu1 %v1032_v20  ;;  %v126_v50 = vld [vmem:[#allocation3 + $0x18] sm:$0xff]  ;;  %v1056_v51 = vpack.c.bf16 %v366_v49, %v365_v48  ;;  %v127_v52 = vld [vmem:[#allocation3 + $0x20] sm:$0xff]  ;;  %v128_v53 = vld [vmem:[#allocation3 + $0x28] sm:$0xff] }
  0x67   :  { %1009 = vmatprep.subr.bf16.mxu0 %v1008_v12  ;;  %1037 = vmatprep.subr.bf16.mxu1 %v1036_v26  ;;  %v129_v54 = vld [vmem:[#allocation3 + $0x30] sm:$0xff]  ;;  %v130_v55 = vld [vmem:[#allocation3 + $0x38] sm:$0xff]  ;;  %v131_v56 = vld [vmem:[#allocation3 + $0x40] sm:$0xff] }
  0x68   :  { %v132_v57 = vld [vmem:[#allocation3 + $0x48] sm:$0xff]  ;;  %v133_v58 = vld [vmem:[#allocation3 + $0x50] sm:$0xff]  ;;  %v134_v59 = vld [vmem:[#allocation3 + $0x58] sm:$0xff] }
  0x69   :  { %v135_v60 = vld [vmem:[#allocation3 + $0x60] sm:$0xff]  ;;  %v136_v61 = vld [vmem:[#allocation3 + $0x68] sm:$0xff]  ;;  %v137_v62 = vld [vmem:[#allocation3 + $0x70] sm:$0xff] }
  0x6a   :  { %1011 = vmatpush3.bf16.msra.mxu0 %v1008_v12  ;;  %1039 = vmatpush3.bf16.msra.mxu1 %v1036_v26  ;;  %v138_v63 = vld [vmem:[#allocation3 + $0x78] sm:$0xff]  ;;  %v535_v0 = vld [vmem:[#allocation11] sm:$0xff]  ;;  %v536_v1 = vld [vmem:[#allocation11 + $0x8] sm:$0xff] }
  0x6b   :  { %1013 = vmatprep.subr.bf16.mxu0 %v1012_v21  ;;  %1041 = vmatprep.subr.bf16.mxu1 %v1040_v32  ;;  %v537_v2 = vld [vmem:[#allocation11 + $0x10] sm:$0xff]  ;;  %v1060_v3 = vpack.c.bf16 %v536_v1, %v535_v0  ;;  %v538_v4 = vld [vmem:[#allocation11 + $0x18] sm:$0xff]  ;;  %v539_v6 = vld [vmem:[#allocation11 + $0x20] sm:$0xff] }
  0x6c   :  { %v1064_v5 = vpack.c.bf16 %v538_v4, %v537_v2  ;;  %v540_v7 = vld [vmem:[#allocation11 + $0x28] sm:$0xff]  ;;  %v541_v9 = vld [vmem:[#allocation11 + $0x30] sm:$0xff]  ;;  %v542_v10 = vld [vmem:[#allocation11 + $0x38] sm:$0xff] }
  0x6d   :  { %v1068_v8 = vpack.c.bf16 %v540_v7, %v539_v6  ;;  %v1072_v11 = vpack.c.bf16 %v542_v10, %v541_v9  ;;  %v543_v12 = vld [vmem:[#allocation11 + $0x40] sm:$0xff]  ;;  %v544_v13 = vld [vmem:[#allocation11 + $0x48] sm:$0xff]  ;;  %v545_v15 = vld [vmem:[#allocation11 + $0x50] sm:$0xff] }
  0x6e   :  { %1015 = vmatpush3.bf16.msra.mxu0 %v1012_v21  ;;  %1043 = vmatpush3.bf16.msra.mxu1 %v1040_v32  ;;  %v1076_v14 = vpack.c.bf16 %v544_v13, %v543_v12  ;;  %v546_v16 = vld [vmem:[#allocation11 + $0x58] sm:$0xff]  ;;  %v547_v18 = vld [vmem:[#allocation11 + $0x60] sm:$0xff]  ;;  %v548_v19 = vld [vmem:[#allocation11 + $0x68] sm:$0xff] }
  0x6f   :  { %1017 = vmatprep.subr.bf16.mxu0 %v1016_v27  ;;  %1045 = vmatprep.subr.bf16.mxu1 %v1044_v38  ;;  %v1080_v17 = vpack.c.bf16 %v546_v16, %v545_v15  ;;  %v1084_v20 = vpack.c.bf16 %v548_v19, %v547_v18  ;;  %v549_v37 = vld [vmem:[#allocation11 + $0x70] sm:$0xff]  ;;  %v731_v40 = vld [vmem:[#allocation9] ss:$0 sm:$0xff] }
  0x72   :  { %1019 = vmatpush3.bf16.msra.mxu0 %v1016_v27  ;;  %1047 = vmatpush3.bf16.msra.mxu1 %v1044_v38  ;;  %v550_v38 = vld [vmem:[#allocation11 + $0x78] sm:$0xff] }
  0x73   :  { %1021 = vmatprep.subr.bf16.mxu0 %v1020_v33  ;;  %1049 = vmatprep.subr.bf16.mxu1 %v1048_v42 }
  0x76   :  { %1023 = vmatpush3.bf16.msra.mxu0 %v1020_v33  ;;  %1051 = vmatpush3.bf16.msra.mxu1 %v1048_v42 }
  0x77   :  { %1025 = vmatprep.subr.bf16.mxu0 %v1024_v39  ;;  %1053 = vmatprep.subr.bf16.mxu1 %v1052_v46 }
  0x7a   :  { %1027 = vmatpush3.bf16.msra.mxu0 %v1024_v39  ;;  %1055 = vmatpush3.bf16.msra.mxu1 %v1052_v46  ;;  %v1088_v39 = vpack.c.bf16 %v550_v38, %v549_v37 }
  0x7b   :  { %1057 = vmatprep.subr.bf16.mxu1 %v1056_v51  ;;  %1061 = vmatprep.subr.bf16.mxu0 %v1060_v3 }
  0x7d   :  { %861 = vmatmul.mubr.f32.vlgmr.msra.gmra.mrb[0].mxu0 %v124_v45 }
  0x7e   :  { %863 = vmatprep.mubr.f32.mxu0 %v125_v47  ;;  %1059 = vmatpush3.bf16.msra.mxu1 %v1056_v51 }
  0x7f   :  { %1092 = vmatprep.subr.bf16.mxu1 %v1060_v3  ;;  %1063 = vmatpush3.bf16.msra.mxu0 %v1060_v3 }
  0x80   :  { %1065 = vmatprep.subr.bf16.mxu0 %v1064_v5 }
  0x81   :  { %864 = vmatmul.mubr.f32.gmra.mrb[2].mxu0 %v126_v50 }
  0x82   :  { %866 = vmatprep.mubr.f32.mxu0 %v127_v52 }
  0x83   :  { %1067 = vmatpush3.bf16.msra.mxu0 %v1064_v5 }
  0x84   :  { %1069 = vmatprep.subr.bf16.mxu0 %v1068_v8 }
  0x85   :  { %867 = vmatmul.mubr.f32.gmra.mrb[4].mxu0 %v128_v53 }
  0x86   :  { %869 = vmatprep.mubr.f32.mxu0 %v129_v54 }
  0x87   :  { %1071 = vmatpush3.bf16.msra.mxu0 %v1068_v8 }
  0x88   :  { %1073 = vmatprep.subr.bf16.mxu0 %v1072_v11 }
  0x89   :  { %870 = vmatmul.mubr.f32.gmra.mrb[6].mxu0 %v130_v55 }
  0x8a   :  { %872 = vmatprep.mubr.f32.mxu0 %v131_v56 }
  0x8b   :  { %1075 = vmatpush3.bf16.msra.mxu0 %v1072_v11 }
  0x8c   :  { %1077 = vmatprep.subr.bf16.mxu0 %v1076_v14 }
  0x8d   :  { %873 = vmatmul.mubr.f32.gmra.mrb[8].mxu0 %v132_v57 }
  0x8e   :  { %875 = vmatprep.mubr.f32.mxu0 %v133_v58 }
  0x8f   :  { %1079 = vmatpush3.bf16.msra.mxu0 %v1076_v14 }
  0x90   :  { %1081 = vmatprep.subr.bf16.mxu0 %v1080_v17 }
  0x91   :  { %876 = vmatmul.mubr.f32.gmra.mrb[10].mxu0 %v134_v59 }
  0x92   :  { %878 = vmatprep.mubr.f32.mxu0 %v135_v60 }
  0x93   :  { %1083 = vmatpush3.bf16.msra.mxu0 %v1080_v17 }
  0x94   :  { %1085 = vmatprep.subr.bf16.mxu0 %v1084_v20 }
  0x95   :  { %879 = vmatmul.mubr.f32.gmra.mrb[12].mxu0 %v136_v61 }
  0x96   :  { %881 = vmatprep.mubr.f32.mxu0 %v137_v62 }
  0x97   :  { %1087 = vmatpush3.bf16.msra.mxu0 %v1084_v20 }
  0x98   :  { %1089 = vmatprep.subr.bf16.mxu0 %v1088_v39 }
  0x99   :  { %882 = vmatmul.mubr.f32.gmra.mrb[14].mxu0 %v138_v63 }
  0x9b   :  { %1091 = vmatpush3.bf16.msra.mxu0 %v1088_v39 }
 0x150   :  { %v862_v21 = vpop.f32.mrb[0].mxu0 }
 0x151   :  { %v221_v22 = vpop.f32.mrb[1].mxu0 }
 0x152   :  { %916 = vmatprep.mubr.f32.mxu1 %v221_v22 }
 0x153   :  { %917 = vmatmul.mubr.f32.vlgmr.msra.gmra.mrb[0].mxu1 %v862_v21 }
 0x154   :  { %v865_v23 = vpop.f32.mrb[2].mxu0  ;;  %1100 = vmatpush3.bf16.msra.mxu1 %v1060_v3 }
 0x155   :  { %v231_v24 = vpop.f32.mrb[3].mxu0  ;;  %1093 = vmatprep.subr.bf16.mxu1 %v1064_v5 }
 0x156   :  { %919 = vmatprep.mubr.f32.mxu1 %v231_v24 }
 0x157   :  { %920 = vmatmul.mubr.f32.gmra.mrb[2].mxu1 %v865_v23 }
 0x158   :  { %v868_v25 = vpop.f32.mrb[4].mxu0  ;;  %1101 = vmatpush3.bf16.msra.mxu1 %v1064_v5 }
 0x159   :  { %v241_v26 = vpop.f32.mrb[5].mxu0  ;;  %1094 = vmatprep.subr.bf16.mxu1 %v1068_v8 }
 0x15a   :  { %922 = vmatprep.mubr.f32.mxu1 %v241_v26 }
 0x15b   :  { %923 = vmatmul.mubr.f32.gmra.mrb[4].mxu1 %v868_v25 }
 0x15c   :  { %v871_v27 = vpop.f32.mrb[6].mxu0  ;;  %1102 = vmatpush3.bf16.msra.mxu1 %v1068_v8 }
 0x15d   :  { %v251_v28 = vpop.f32.mrb[7].mxu0  ;;  %1095 = vmatprep.subr.bf16.mxu1 %v1072_v11 }
 0x15e   :  { %925 = vmatprep.mubr.f32.mxu1 %v251_v28 }
 0x15f   :  { %926 = vmatmul.mubr.f32.gmra.mrb[6].mxu1 %v871_v27 }
 0x160   :  { %v874_v29 = vpop.f32.mrb[8].mxu0  ;;  %1103 = vmatpush3.bf16.msra.mxu1 %v1072_v11 }
 0x161   :  { %v261_v30 = vpop.f32.mrb[9].mxu0  ;;  %1096 = vmatprep.subr.bf16.mxu1 %v1076_v14 }
 0x162   :  { %928 = vmatprep.mubr.f32.mxu1 %v261_v30 }
 0x163   :  { %929 = vmatmul.mubr.f32.gmra.mrb[8].mxu1 %v874_v29 }
 0x164   :  { %v877_v31 = vpop.f32.mrb[10].mxu0  ;;  %1104 = vmatpush3.bf16.msra.mxu1 %v1076_v14 }
 0x165   :  { %v271_v32 = vpop.f32.mrb[11].mxu0  ;;  %1097 = vmatprep.subr.bf16.mxu1 %v1080_v17 }
 0x166   :  { %931 = vmatprep.mubr.f32.mxu1 %v271_v32 }
 0x167   :  { %932 = vmatmul.mubr.f32.gmra.mrb[10].mxu1 %v877_v31 }
 0x168   :  { %v880_v33 = vpop.f32.mrb[12].mxu0  ;;  %1105 = vmatpush3.bf16.msra.mxu1 %v1080_v17 }
 0x169   :  { %v281_v34 = vpop.f32.mrb[13].mxu0  ;;  %1098 = vmatprep.subr.bf16.mxu1 %v1084_v20 }
 0x16a   :  { %934 = vmatprep.mubr.f32.mxu1 %v281_v34 }
 0x16b   :  { %935 = vmatmul.mubr.f32.gmra.mrb[12].mxu1 %v880_v33 }
 0x16c   :  { %v883_v35 = vpop.f32.mrb[14].mxu0  ;;  %1106 = vmatpush3.bf16.msra.mxu1 %v1084_v20 }
 0x16d   :  { %v291_v36 = vpop.f32.mrb[15].mxu0  ;;  %1099 = vmatprep.subr.bf16.mxu1 %v1088_v39 }
 0x16e   :  { %937 = vmatprep.mubr.f32.mxu1 %v291_v36 }
 0x16f   :  { %938 = vmatmul.mubr.f32.gmra.mrb[14].mxu1 %v883_v35 }
 0x170   :  { %1107 = vmatpush3.bf16.msra.mxu1 %v1088_v39 }
 0x226   :  { %v918_v41 = vpop.f32.mrb[0].mxu1 }
 0x227   :  { %v446_v42 = vadd.f32 %v918_v41, %v731_v40  ;;  %v440_v43 = vpop.f32.mrb[1].mxu1 }
 0x228   :  { %v441_v44 = vadd.f32 %v731_v40, %v440_v43 }
 0x229   :  { %v520_v47 = vmax.f32 %v446_v42, 0.0 }
 0x22a   :  { %v519_v45 = vmax.f32 %v441_v44, 0.0  ;;  %v921_v46 = vpop.f32.mrb[2].mxu1 }
 0x22b   :  { %v456_v48 = vadd.f32 %v921_v46, %v731_v40  ;;  %v450_v49 = vpop.f32.mrb[3].mxu1 }
 0x22c   :  { %v451_v50 = vadd.f32 %v731_v40, %v450_v49  ;;  %972 = vmatprep.mubr.f32.mxu0 %v519_v45 }
 0x22d   :  { %973 = vmatmul.mubr.f32.vlgmr.msra.gmra.mrb[16].mxu0 %v520_v47  ;;  %v522_v53 = vmax.f32 %v456_v48, 0.0 }
 0x22e   :  { %v521_v51 = vmax.f32 %v451_v50, 0.0  ;;  %v924_v52 = vpop.f32.mrb[4].mxu1 }
 0x22f   :  { %v466_v54 = vadd.f32 %v924_v52, %v731_v40  ;;  %v460_v55 = vpop.f32.mrb[5].mxu1 }
 0x230   :  { %v461_v56 = vadd.f32 %v731_v40, %v460_v55  ;;  %975 = vmatprep.mubr.f32.mxu0 %v521_v51 }
 0x231   :  { %976 = vmatmul.mubr.f32.gmra.mrb[18].mxu0 %v522_v53  ;;  %v524_v59 = vmax.f32 %v466_v54, 0.0 }
 0x232   :  { %v523_v57 = vmax.f32 %v461_v56, 0.0  ;;  %v927_v58 = vpop.f32.mrb[6].mxu1 }
 0x233   :  { %v476_v60 = vadd.f32 %v927_v58, %v731_v40  ;;  %v470_v61 = vpop.f32.mrb[7].mxu1 }
 0x234   :  { %v471_v62 = vadd.f32 %v731_v40, %v470_v61  ;;  %978 = vmatprep.mubr.f32.mxu0 %v523_v57 }
 0x235   :  { %979 = vmatmul.mubr.f32.gmra.mrb[20].mxu0 %v524_v59  ;;  %v526_v1 = vmax.f32 %v476_v60, 0.0 }
 0x236   :  { %v525_v63 = vmax.f32 %v471_v62, 0.0  ;;  %v930_v0 = vpop.f32.mrb[8].mxu1 }
 0x237   :  { %v486_v2 = vadd.f32 %v930_v0, %v731_v40  ;;  %v480_v3 = vpop.f32.mrb[9].mxu1 }
 0x238   :  { %v481_v4 = vadd.f32 %v731_v40, %v480_v3  ;;  %981 = vmatprep.mubr.f32.mxu0 %v525_v63 }
 0x239   :  { %982 = vmatmul.mubr.f32.gmra.mrb[22].mxu0 %v526_v1  ;;  %v528_v7 = vmax.f32 %v486_v2, 0.0 }
 0x23a   :  { %v527_v5 = vmax.f32 %v481_v4, 0.0  ;;  %v933_v6 = vpop.f32.mrb[10].mxu1 }
 0x23b   :  { %v496_v8 = vadd.f32 %v933_v6, %v731_v40  ;;  %v490_v9 = vpop.f32.mrb[11].mxu1 }
 0x23c   :  { %v491_v10 = vadd.f32 %v731_v40, %v490_v9  ;;  %984 = vmatprep.mubr.f32.mxu1 %v527_v5 }
 0x23d   :  { %985 = vmatmul.mubr.f32.vlgmr.msra.gmra.mrb[16].mxu1 %v528_v7  ;;  %v530_v13 = vmax.f32 %v496_v8, 0.0 }
 0x23e   :  { %v529_v11 = vmax.f32 %v491_v10, 0.0  ;;  %v936_v12 = vpop.f32.mrb[12].mxu1 }
 0x23f   :  { %v506_v14 = vadd.f32 %v936_v12, %v731_v40  ;;  %v500_v15 = vpop.f32.mrb[13].mxu1 }
 0x240   :  { %v501_v16 = vadd.f32 %v731_v40, %v500_v15  ;;  %987 = vmatprep.mubr.f32.mxu1 %v529_v11 }
 0x241   :  { %988 = vmatmul.mubr.f32.gmra.mrb[18].mxu1 %v530_v13  ;;  %v532_v19 = vmax.f32 %v506_v14, 0.0 }
 0x242   :  { %v531_v17 = vmax.f32 %v501_v16, 0.0  ;;  %v939_v18 = vpop.f32.mrb[14].mxu1 }
 0x243   :  { %v516_v20 = vadd.f32 %v939_v18, %v731_v40  ;;  %v510_v21 = vpop.f32.mrb[15].mxu1 }
 0x244   :  { %v511_v22 = vadd.f32 %v731_v40, %v510_v21  ;;  %990 = vmatprep.mubr.f32.mxu1 %v531_v17 }
 0x245   :  { %991 = vmatmul.mubr.f32.gmra.mrb[20].mxu1 %v532_v19  ;;  %v534_v24 = vmax.f32 %v516_v20, 0.0 }
 0x246   :  { %v533_v23 = vmax.f32 %v511_v22, 0.0 }
 0x248   :  { %993 = vmatprep.mubr.f32.mxu1 %v533_v23 }
 0x249   :  { %994 = vmatmul.mubr.f32.gmra.mrb[22].mxu1 %v534_v24 }
 0x300   :  { %v974_v25 = vpop.f32.mrb[16].mxu0 }
 0x301   :  { %697 = vst [vmem:[#allocation12 + $0x8] sm:$0xff] %v974_v25  ;;  %v617_v26 = vpop.f32.mrb[17].mxu0 }
 0x302   :  { %696 = vst [vmem:[#allocation12] sm:$0xff] %v617_v26 }
 0x304   :  { %v977_v27 = vpop.f32.mrb[18].mxu0 }
 0x305   :  { %699 = vst [vmem:[#allocation12 + $0x18] sm:$0xff] %v977_v27  ;;  %v627_v28 = vpop.f32.mrb[19].mxu0 }
 0x306   :  { %698 = vst [vmem:[#allocation12 + $0x10] sm:$0xff] %v627_v28 }
 0x308   :  { %v980_v29 = vpop.f32.mrb[20].mxu0 }
 0x309   :  { %701 = vst [vmem:[#allocation12 + $0x28] sm:$0xff] %v980_v29  ;;  %v637_v30 = vpop.f32.mrb[21].mxu0 }
 0x30a   :  { %700 = vst [vmem:[#allocation12 + $0x20] sm:$0xff] %v637_v30 }
 0x30c   :  { %v983_v31 = vpop.f32.mrb[22].mxu0 }
 0x30d   :  { %703 = vst [vmem:[#allocation12 + $0x38] sm:$0xff] %v983_v31  ;;  %v647_v32 = vpop.f32.mrb[23].mxu0 }
 0x30e   :  { %702 = vst [vmem:[#allocation12 + $0x30] sm:$0xff] %v647_v32 }
 0x310   :  { %v986_v33 = vpop.f32.mrb[16].mxu1 }
 0x311   :  { %705 = vst [vmem:[#allocation12 + $0x48] sm:$0xff] %v986_v33  ;;  %v657_v34 = vpop.f32.mrb[17].mxu1 }
 0x312   :  { %704 = vst [vmem:[#allocation12 + $0x40] sm:$0xff] %v657_v34 }
 0x314   :  { %v989_v35 = vpop.f32.mrb[18].mxu1 }
 0x315   :  { %707 = vst [vmem:[#allocation12 + $0x58] sm:$0xff] %v989_v35  ;;  %v667_v36 = vpop.f32.mrb[19].mxu1 }
 0x316   :  { %706 = vst [vmem:[#allocation12 + $0x50] sm:$0xff] %v667_v36 }
 0x318   :  { %v992_v37 = vpop.f32.mrb[20].mxu1 }
 0x319   :  { %709 = vst [vmem:[#allocation12 + $0x68] sm:$0xff] %v992_v37  ;;  %v677_v38 = vpop.f32.mrb[21].mxu1 }
 0x31a   :  { %708 = vst [vmem:[#allocation12 + $0x60] sm:$0xff] %v677_v38 }
 0x31c   :  { %v995_v39 = vpop.f32.mrb[22].mxu1 }
 0x31d   :  { %711 = vst [vmem:[#allocation12 + $0x78] sm:$0xff] %v995_v39  ;;  %v687_v40 = vpop.f32.mrb[23].mxu1 }
 0x31e   :  { %710 = vst [vmem:[#allocation12 + $0x70] sm:$0xff] %v687_v40 }
 0x31f   :  { %1237 = shalt.err (!%p1234_p2)
}
 0x320   :  { %s1238_s8 = scalar_lea.hbm %s1401_s5, 2048 }
 0x321   :  { %p1239_p3 = scmp.ne.s32.totalorder %s1401_s5, %s1238_s8  ;;  %p1242_p4 = scmp.lt.u32.totalorder %s1238_s8, %s1401_s5 }
 0x323   :  { %p1244_p5 = pnand %p1242_p4, %p1239_p3 }
 0x325   :  { %1247 = shalt.err (!%p1244_p5)
}
 0x326   :  { %723 = dma.vmem_to_hbm [thread:$0]  %s718_s29, 2048, %s1401_s5, [#allocation5], %s1258_s30, %s1258_s30, %s1259_s6  }
 0x327   :  { %1254 = dma.done.wait [#allocation5], 2048  }
 0x328   :  { %1255 = vsyncadd [#allocation5], 4294965248 }
 0x329   :  { %727 = vsyncpa [#allocation4], 1 }
 0x32a   :  { %728 = vsyncpa [#allocation7], 1 }
 0x32b   :  { %729 = vsyncpa [#allocation10], 1 }
 0x32c   :  { %730 = vsyncpa [#allocation5], 1 }

// kernel: macro_gcn_forward.3
= control target key start
LH: loop header
LB: loop body
LE: loop exit
PB: predicated region body
PF: predicated region fallthrough
CT: control target
= control target key end

     0   :  { %s69_s0 = inlined_call_operand.<no memory space> [shape: f32[1], index: 0, kind: input, shape index: {}]   ;;  %s70_s1 = inlined_call_operand.vmem [shape: f32[8,128], index: 1, kind: input, shape index: {}]   ;;  %s71_s2 = inlined_call_operand.vmem [shape: f32[8,128], index: 2, kind: input, shape index: {}]   ;;  %s72_s3 = inlined_call_operand.vmem [shape: f32[8,128], index: 3, kind: output, shape index: {}]  }
   0x1   :  { %v15_v0 = vld [vmem:[%s70_s1] sm:$0xff]  ;;  %v19_v2 = vstv %s69_s0 }
   0x2   :  { %v16_v1 = vld [vmem:[%s71_s2] sm:$0xff] }
   0x3   :  { %v17_v3 = vadd.f32 %v16_v1, %v15_v0 }
   0x5   :  { %v20_v4 = vadd.f32 %v19_v2, %v17_v3 }
   0x7   :  { %v32_v5 = vmul.f32 -1.442695, %v20_v4 }
   0x9   :  { %33 = vpow2.f32 %v32_v5 }
  0x13   :  { %v34_v6 = vpop.eup %33 }
  0x14   :  { %v24_v7 = vadd.f32 1.0, %v34_v6 }
  0x16   :  { %35 = vrcp.f32 %v24_v7 }
  0x20   :  { %v36_v8 = vpop.eup %35 }
  0x21   :  { %27 = vst [vmem:[%s72_s3] sm:$0xff] %v36_v8 }

</bundles_post_ra>
